<compile_context>
chip_gen: v5e
topology: v5e:2x2
jax: 0.10.0
libtpu: 0.0.40
codegen_flags: <defaults>
</compile_context>

<pallas_src>
import functools
import math

import jax
import jax.numpy as jnp
from jax.experimental import pallas as pl
from jax.experimental.pallas import tpu as pltpu

_SQRT2 = math.sqrt(2.0)
_EPS = 1e-5  # nn.GroupNorm default eps


def _gelu_exact(x):
    # PyTorch nn.GELU() default == exact erf formulation
    return 0.5 * x * (1.0 + jax.lax.erf(x / _SQRT2))


def _res_conv_block_kernel(*refs, NB, L, C_in, C_mid, C_out,
                           is_last, has_conv_skip, mm_dtype):
    if has_conv_skip:
        x_ref, w1_ref, w2_ref, pp_ref, wskip_ref, o_ref = refs
    else:
        x_ref, w1_ref, w2_ref, pp_ref, o_ref = refs
        wskip_ref = None

    NBL = NB * L
    f32 = jnp.float32

    # ---- hoisted lane bookkeeping (position within sample / sample id) ----
    lane = jax.lax.broadcasted_iota(jnp.int32, (1, NBL), 1)
    pos = lane % L
    # Tap offset d reads src[:, l + d]; lanes whose source would fall outside
    # the sample (conv padding=2 edges and cross-sample boundaries after the
    # lane merge) are zeroed.
    tap_mask = {-2: pos >= 2, -1: pos >= 1, 1: pos <= L - 2, 2: pos <= L - 3}
    sid = lane // L if NB > 1 else None

    def conv5(src_f32, w_ref):
        """5-tap conv (padding=2) on the lane-merged (C, NB*L) activation:
        one (C_out_k, C_in_k) x (C_in_k, NB*L) MXU matmul per tap with f32
        accumulation.  Lane shifts use pltpu.roll (XLU slot) + hoisted masks;
        no concatenates, no per-sample unrolled loop, no padded scratch."""
        acc = jnp.dot(w_ref[2], src_f32.astype(mm_dtype),
                      preferred_element_type=f32)
        for d in (-2, -1, 1, 2):
            shifted = pltpu.roll(src_f32, (-d) % NBL, 1)  # out[:, l] = src[:, l+d]
            tap = jnp.where(tap_mask[d], shifted, 0.0).astype(mm_dtype)
            acc = acc + jnp.dot(w_ref[d + 2], tap, preferred_element_type=f32)
        return acc

    def gn_gelu(h, gamma, beta, apply_gelu):
        """GroupNorm(num_groups=1) per sample over (C, L), fused exact GELU.
        Stats: one sublane-reduction traversal each for sum / sum-of-squares;
        the per-sample finish + broadcast-back is on (1, NB*L) rows only."""
        cnt = float(h.shape[0] * L)
        cs = jnp.sum(h, axis=0, keepdims=True)          # (1, NBL)
        css = jnp.sum(h * h, axis=0, keepdims=True)     # (1, NBL)
        if NB == 1:
            mean = jnp.sum(cs) / cnt
            inv = jax.lax.rsqrt(jnp.sum(css) / cnt - mean * mean + _EPS)
            inv_lane = inv
            shift_lane = mean * inv
        else:
            # Per-sample segment stats; all of this is O(NB*L) row-vector /
            # scalar work, negligible next to the conv matmuls.
            inv_lane = jnp.zeros((1, NBL), f32)
            shift_lane = jnp.zeros((1, NBL), f32)
            for nb in range(NB):
                lo, hi = nb * L, (nb + 1) * L
                mean = jnp.sum(cs[:, lo:hi]) / cnt
                inv = jax.lax.rsqrt(jnp.sum(css[:, lo:hi]) / cnt
                                    - mean * mean + _EPS)
                in_seg = sid == nb
                inv_lane = jnp.where(in_seg, inv, inv_lane)
                shift_lane = jnp.where(in_seg, mean * inv, shift_lane)
        y = gamma * (h * inv_lane - shift_lane) + beta
        return _gelu_exact(y) if apply_gelu else y

    # packed per-channel params (single DMA)
    b1 = pp_ref[:C_mid, 0:1]
    g1 = pp_ref[:C_mid, 1:2]
    be1 = pp_ref[:C_mid, 2:3]
    b2 = pp_ref[:C_out, 3:4]

    x32 = x_ref[...]                                    # (C_in, NBL) f32

    # residual: identity stays in f32 (no bf16 round-trip); the 1x1 conv skip
    # is a deliberate mixed-precision matmul with f32 accumulation.
    if has_conv_skip:
        residual = jnp.dot(wskip_ref[...], x32.astype(mm_dtype),
                           preferred_element_type=f32)
    else:
        residual = x32

    h = conv5(x32, w1_ref) + b1                         # conv_1
    h = gn_gelu(h, g1, be1, apply_gelu=True)            # group_norm_1 + gelu_1
    h2 = conv5(h, w2_ref) + b2                          # conv_2
    if not is_last:
        g2 = pp_ref[:C_out, 4:5]
        be2 = pp_ref[:C_out, 5:6]
        h2 = gn_gelu(h2, g2, be2, apply_gelu=True)      # group_norm_2 + gelu_2

    o_ref[...] = (h2 + residual).astype(o_ref.dtype)    # lane-dense wide store


def _vmem_capacity_bytes():
    try:
        return int(pltpu.get_tpu_info().vmem_capacity_bytes)
    except Exception:
        return 64 * 1024 * 1024   # v7x per-TensorCore capacity: safe lower bound


def _pick_batch_block(N, L, C_in, C_mid, C_out, mm_bytes):
    """Largest batch block NB (dividing N) such that
      * the lane block NB*L is a multiple of 128 (unmasked wide stores) or the
        whole array,
      * the double-buffered I/O blocks + live intermediates fit a conservative
        fraction of this generation's VMEM (64 MiB on v7x, 128 MiB otherwise),
      * >= 2 grid steps remain when possible (megacore / v7x dual TensorCore).
    """
    budget = int(0.45 * _vmem_capacity_bytes())
    per_sample = L * (
        2 * 2 * 4 * (C_in + C_out)               # double-buffered in/out blocks
        + 4 * (C_in + 3 * C_mid + 3 * C_out)     # live f32 intermediates
        + mm_bytes * (C_in + C_mid))             # mm-dtype matmul operands
    divisors = [d for d in range(1, N + 1) if N % d == 0]
    cand = [d for d in divisors if (d * L) % 128 == 0 or d == N]
    fit = [d for d in cand if d * per_sample <= budget] or [min(cand)]
    pref = [d for d in fit if N // d >= 2 and (d * L) % 128 == 0]
    return max(pref) if pref else max(fit)


def res_conv_block(x, params, *, is_last=False, batch_block=None,
                   matmul_dtype=jnp.bfloat16):
    """x: (N, C_in, L) float32 -> (N, C_out, L) float32."""
    N, C_in, L = x.shape
    C_mid = params["w1"].shape[0]
    C_out = params["w2"].shape[0]
    has_conv_skip = C_in != C_out
    mm_bytes = jnp.dtype(matmul_dtype).itemsize

    if batch_block is None:
        NB = _pick_batch_block(N, L, C_in, C_mid, C_out, mm_bytes)
    else:
        NB = batch_block
    assert N % NB == 0, (N, NB)
    assert (NB * L) % 128 == 0 or NB == N, (NB, L)
    n_blocks = N // NB
    # TODO(synk): for n_blocks == 1 on v7x, add a second "parallel" grid axis
    # over L tiles (with a +/-2-lane halo) so both TensorCores are engaged.

    # Lane-merged activation layout (layout plumbing done by XLA outside the
    # kernel): whole samples side by side on the lane axis.
    x2 = jnp.transpose(x.astype(jnp.float32), (1, 0, 2)).reshape(C_in, N * L)

    # Per-tap weights: w*_taps[k] == w[:, :, k]  (tap offset d = k - 2).
    w1t = jnp.transpose(params["w1"], (2, 0, 1)).astype(matmul_dtype)  # (5, C_mid, C_in)
    w2t = jnp.transpose(params["w2"], (2, 0, 1)).astype(matmul_dtype)  # (5, C_out, C_mid)

    # Pack all per-channel vectors into one (C_max, 8) array (1 DMA).
    C_max = max(C_mid, C_out)
    pp = jnp.zeros((C_max, 8), jnp.float32)
    pp = pp.at[:C_mid, 0].set(params["b1"].astype(jnp.float32))
    pp = pp.at[:C_mid, 1].set(params["g1"].astype(jnp.float32))
    pp = pp.at[:C_mid, 2].set(params["be1"].astype(jnp.float32))
    pp = pp.at[:C_out, 3].set(params["b2"].astype(jnp.float32))
    if not is_last:
        pp = pp.at[:C_out, 4].set(params["g2"].astype(jnp.float32))
        pp = pp.at[:C_out, 5].set(params["be2"].astype(jnp.float32))

    inputs = [x2, w1t, w2t, pp]
    in_specs = [
        pl.BlockSpec((C_in, NB * L), lambda b: (0, b)),
        # Grid-invariant blocks (never re-fetched).
        # TODO(synk): pipeline_mode=pl.Buffered(1) here would drop the unused
        # second pipelining buffer on VMEM-tight v7x.
        pl.BlockSpec((5, C_mid, C_in), lambda b: (0, 0, 0)),
        pl.BlockSpec((5, C_out, C_mid), lambda b: (0, 0, 0)),
        pl.BlockSpec((C_max, 8), lambda b: (0, 0)),
    ]
    if has_conv_skip:
        inputs.append(params["w_skip"][:, :, 0].astype(matmul_dtype))
        in_specs.append(pl.BlockSpec((C_out, C_in), lambda b: (0, 0)))

    kernel = functools.partial(
        _res_conv_block_kernel,
        NB=NB, L=L, C_in=C_in, C_mid=C_mid, C_out=C_out,
        is_last=is_last, has_conv_skip=has_conv_skip, mm_dtype=matmul_dtype)

    flops = 2 * N * L * (5 * C_mid * C_in + 5 * C_out * C_mid
                         + (C_out * C_in if has_conv_skip else 0))
    transcendentals = N * L * (C_mid + (0 if is_last else C_out))
    bytes_accessed = (4 * N * L * (C_in + C_out) + 4 * C_max * 8
                      + mm_bytes * (5 * C_mid * C_in + 5 * C_out * C_mid
                                    + (C_out * C_in if has_conv_skip else 0)))

    out2 = pl.pallas_call(
        kernel,
        out_shape=jax.ShapeDtypeStruct((C_out, N * L), jnp.float32),
        grid_spec=pltpu.PrefetchScalarGridSpec(
            num_scalar_prefetch=0,
            grid=(n_blocks,),
            in_specs=in_specs,
            out_specs=pl.BlockSpec((C_out, NB * L), lambda b: (0, b)),
        ),
        compiler_params=pltpu.CompilerParams(
            dimension_semantics=("parallel",),
            vmem_limit_bytes=int(0.7 * _vmem_capacity_bytes())),
        cost_estimate=pl.CostEstimate(
            flops=flops, transcendentals=transcendentals,
            bytes_accessed=bytes_accessed),
    )(*inputs)

    return out2.reshape(C_out, N, L).transpose(1, 0, 2)


# ---------------- pure-JAX reference (for correctness check) ----------------
def _ref_conv1d(x, w, b=None, padding=0):
    y = jax.lax.conv_general_dilated(
        x, w, window_strides=(1,), padding=[(padding, padding)],
        dimension_numbers=("NCH", "OIH", "NCH"))
    if b is not None:
        y = y + b[None, :, None]
    return y


def _ref_gn1(x, gamma, beta, eps=_EPS):
    mean = jnp.mean(x, axis=(1, 2), keepdims=True)
    var = jnp.mean((x - mean) ** 2, axis=(1, 2), keepdims=True)
    xn = (x - mean) / jnp.sqrt(var + eps)
    return xn * gamma[None, :, None] + beta[None, :, None]


def _reference(x, p, is_last):
    C_in = x.shape[1]
    C_out = p["w2"].shape[0]
    residual = _ref_conv1d(x, p["w_skip"]) if C_in != C_out else x
    h = _ref_conv1d(x, p["w1"], p["b1"], padding=2)
    h = _gelu_exact(_ref_gn1(h, p["g1"], p["be1"]))
    h = _ref_conv1d(h, p["w2"], p["b2"], padding=2)
    if not is_last:
        h = _gelu_exact(_ref_gn1(h, p["g2"], p["be2"]))
    return h + residual


def _make_params(key, c_in, c_mid, c_out, is_last):
    ks = jax.random.split(key, 9)
    p = {
        "w1": 0.1 * jax.random.normal(ks[0], (c_mid, c_in, 5), jnp.float32),
        "b1": 0.1 * jax.random.normal(ks[1], (c_mid,), jnp.float32),
        "g1": 1.0 + 0.1 * jax.random.normal(ks[2], (c_mid,), jnp.float32),
        "be1": 0.1 * jax.random.normal(ks[3], (c_mid,), jnp.float32),
        "w2": 0.1 * jax.random.normal(ks[4], (c_out, c_mid, 5), jnp.float32),
        "b2": 0.1 * jax.random.normal(ks[5], (c_out,), jnp.float32),
    }
    if not is_last:
        p["g2"] = 1.0 + 0.1 * jax.random.normal(ks[6], (c_out,), jnp.float32)
        p["be2"] = 0.1 * jax.random.normal(ks[7], (c_out,), jnp.float32)
    if c_in != c_out:
        p["w_skip"] = 0.1 * jax.random.normal(ks[8], (c_out, c_in, 1), jnp.float32)
    return p


if __name__ == "__main__":
    key = jax.random.PRNGKey(0)
    k1, k2, kx1, kx2 = jax.random.split(key, 4)

    # Case 1: conv skip (C_in != C_out), GN2+GELU2 active, default bf16
    # matmuls, NB=1 -> two parallel grid steps, 128-lane blocks.
    N, C_in, C_mid, C_out, L = 2, 4, 8, 8, 128
    params1 = _make_params(k1, C_in, C_mid, C_out, is_last=False)
    x1 = jax.random.normal(kx1, (N, C_in, L), jnp.float32)
    out1 = jax.block_until_ready(res_conv_block(x1, params1, is_last=False))
    ref1 = _reference(x1, params1, is_last=False)
    assert out1.shape == (N, C_out, L), out1.shape
    err1 = float(jnp.max(jnp.abs(out1 - ref1)))
    if err1 > 1e-1:
        raise SystemExit(f"case1 (bf16) mismatch vs reference: max abs err = {err1}")

    # Case 2: identity skip, is_last=True, f32 matmuls, NB=2 (multi-sample
    # lane merge + per-segment GroupNorm stats), two grid steps.
    N2, C2, L2 = 4, 8, 64
    params2 = _make_params(k2, C2, C2, C2, is_last=True)
    x2 = jax.random.normal(kx2, (N2, C2, L2), jnp.float32)
    out2 = jax.block_until_ready(
        res_conv_block(x2, params2, is_last=True, matmul_dtype=jnp.float32))
    ref2 = _reference(x2, params2, is_last=True)
    assert out2.shape == (N2, C2, L2), out2.shape
    err2 = float(jnp.max(jnp.abs(out2 - ref2)))
    if err2 > 5e-3:
        raise SystemExit(f"case2 (f32) mismatch vs reference: max abs err = {err2}")

    print("KERNEL_OK")
</pallas_src>

<mosaic_0001>
module attributes {stable_mosaic.version = 11 : i64} {
  func.func @_res_conv_block_kernel(%arg0: i32, %arg1: memref<4x128xf32, #tpu.memory_space<vmem>>, %arg2: memref<5x8x4xbf16, #tpu.memory_space<vmem>>, %arg3: memref<5x8x8xbf16, #tpu.memory_space<vmem>>, %arg4: memref<8x8xf32, #tpu.memory_space<vmem>>, %arg5: memref<8x4xbf16, #tpu.memory_space<vmem>>, %arg6: memref<8x128xf32, #tpu.memory_space<vmem>>) attributes {dimension_semantics = [#tpu.dimension_semantics<parallel>], iteration_bounds = array<i64: 2>, scalar_prefetch = 0 : i64, scratch_operands = 0 : i64, tpu.core_type = #tpu.core_type<tc>, window_params = [{transform_indices = @transform_0, window_bounds = array<i64: 4, 128>}, {pipeline_mode = #tpu.pipeline_mode<synchronous>, transform_indices = @transform_1, window_bounds = array<i64: 5, 8, 4>}, {pipeline_mode = #tpu.pipeline_mode<synchronous>, transform_indices = @transform_2, window_bounds = array<i64: 5, 8, 8>}, {pipeline_mode = #tpu.pipeline_mode<synchronous>, transform_indices = @transform_3, window_bounds = array<i64: 8, 8>}, {pipeline_mode = #tpu.pipeline_mode<synchronous>, transform_indices = @transform_4, window_bounds = array<i64: 8, 4>}, {transform_indices = @transform_5, window_bounds = array<i64: 8, 128>}]} {
    %0 = tpu.iota {dimensions = array<i32: 1>} : vector<1x128xi32>
    %c128_i32 = arith.constant 128 : i32
    %c0_i32 = arith.constant 0 : i32
    %1 = arith.cmpi eq, %c128_i32, %c0_i32 : i32
    %c1_i32 = arith.constant 1 : i32
    %2 = arith.select %1, %c1_i32, %c128_i32 : i32
    %3 = vector.broadcast %2 : i32 to vector<1x128xi32>
    %4 = arith.remsi %0, %3 : vector<1x128xi32>
    %c0_i32_0 = arith.constant 0 : i32
    %5 = vector.broadcast %c0_i32_0 : i32 to vector<1x128xi32>
    %6 = arith.cmpi ne, %4, %5 : vector<1x128xi32>
    %c0_i32_1 = arith.constant 0 : i32
    %7 = vector.broadcast %c0_i32_1 : i32 to vector<1x128xi32>
    %8 = arith.cmpi slt, %4, %7 : vector<1x128xi32>
    %c0_i32_2 = arith.constant 0 : i32
    %9 = arith.cmpi slt, %2, %c0_i32_2 : i32
    %10 = vector.broadcast %9 : i1 to vector<1x128xi1>
    %11 = vector.broadcast %10 : vector<1x128xi1> to vector<1x128xi1>
    %12 = arith.xori %8, %11 : vector<1x128xi1>
    %13 = arith.andi %12, %6 : vector<1x128xi1>
    %14 = vector.broadcast %2 : i32 to vector<1x128xi32>
    %15 = arith.addi %4, %14 : vector<1x128xi32>
    %16 = arith.select %13, %15, %4 : vector<1x128xi1>, vector<1x128xi32>
    %c2_i32 = arith.constant 2 : i32
    %17 = vector.broadcast %c2_i32 : i32 to vector<1x128xi32>
    %18 = arith.cmpi sge, %16, %17 : vector<1x128xi32>
    %c1_i32_3 = arith.constant 1 : i32
    %19 = vector.broadcast %c1_i32_3 : i32 to vector<1x128xi32>
    %20 = arith.cmpi sge, %16, %19 : vector<1x128xi32>
    %c126_i32 = arith.constant 126 : i32
    %21 = vector.broadcast %c126_i32 : i32 to vector<1x128xi32>
    %22 = arith.cmpi sle, %16, %21 : vector<1x128xi32>
    %c125_i32 = arith.constant 125 : i32
    %23 = vector.broadcast %c125_i32 : i32 to vector<1x128xi32>
    %24 = arith.cmpi sle, %16, %23 : vector<1x128xi32>
    %c0 = arith.constant 0 : index
    %c0_4 = arith.constant 0 : index
    %25 = vector.load %arg4[%c0, %c0_4] : memref<8x8xf32, #tpu.memory_space<vmem>>, vector<8x1xf32>
    %c0_5 = arith.constant 0 : index
    %c1 = arith.constant 1 : index
    %26 = vector.load %arg4[%c0_5, %c1] : memref<8x8xf32, #tpu.memory_space<vmem>>, vector<8x1xf32>
    %c0_6 = arith.constant 0 : index
    %c2 = arith.constant 2 : index
    %27 = vector.load %arg4[%c0_6, %c2] : memref<8x8xf32, #tpu.memory_space<vmem>>, vector<8x1xf32>
    %c0_7 = arith.constant 0 : index
    %c3 = arith.constant 3 : index
    %28 = vector.load %arg4[%c0_7, %c3] : memref<8x8xf32, #tpu.memory_space<vmem>>, vector<8x1xf32>
    %c0_8 = arith.constant 0 : index
    %c0_9 = arith.constant 0 : index
    %29 = vector.load %arg1[%c0_8, %c0_9] : memref<4x128xf32, #tpu.memory_space<vmem>>, vector<4x128xf32>
    %c0_10 = arith.constant 0 : index
    %c0_11 = arith.constant 0 : index
    %30 = vector.load %arg5[%c0_10, %c0_11] : memref<8x4xbf16, #tpu.memory_space<vmem>>, vector<8x4xbf16>
    %31 = arith.truncf %29 : vector<4x128xf32> to vector<4x128xbf16>
    %cst = arith.constant dense<0.000000e+00> : vector<8x128xf32>
    %32 = tpu.matmul %30, %31, %cst {dimension_numbers = #tpu.dot_dimension_numbers<[1], [0], [0], [1], [0, 0, 1, 1], [], []>} : vector<8x4xbf16>, vector<4x128xbf16>, vector<8x128xf32> -> vector<8x128xf32>
    %c2_12 = arith.constant 2 : index
    %c0_13 = arith.constant 0 : index
    %c0_14 = arith.constant 0 : index
    %33 = vector.load %arg2[%c2_12, %c0_13, %c0_14] : memref<5x8x4xbf16, #tpu.memory_space<vmem>>, vector<1x8x4xbf16>
    %34 = vector.shape_cast %33 : vector<1x8x4xbf16> to vector<8x4xbf16>
    %35 = arith.truncf %29 : vector<4x128xf32> to vector<4x128xbf16>
    %cst_15 = arith.constant dense<0.000000e+00> : vector<8x128xf32>
    %36 = tpu.matmul %34, %35, %cst_15 {dimension_numbers = #tpu.dot_dimension_numbers<[1], [0], [0], [1], [0, 0, 1, 1], [], []>} : vector<8x4xbf16>, vector<4x128xbf16>, vector<8x128xf32> -> vector<8x128xf32>
    %c2_i32_16 = arith.constant 2 : i32
    %37 = tpu.dynamic_rotate %29 by %c2_i32_16 dim 1 : vector<4x128xf32>, i32 -> vector<4x128xf32>
    %cst_17 = arith.constant 0.000000e+00 : f32
    %38 = vector.shape_cast %18 : vector<1x128xi1> to vector<1x128xi1>
    %39 = vector.broadcast %38 : vector<1x128xi1> to vector<4x128xi1>
    %40 = vector.broadcast %cst_17 : f32 to vector<4x128xf32>
    %41 = arith.select %39, %37, %40 : vector<4x128xi1>, vector<4x128xf32>
    %42 = arith.truncf %41 : vector<4x128xf32> to vector<4x128xbf16>
    %c0_18 = arith.constant 0 : index
    %c0_19 = arith.constant 0 : index
    %c0_20 = arith.constant 0 : index
    %43 = vector.load %arg2[%c0_18, %c0_19, %c0_20] : memref<5x8x4xbf16, #tpu.memory_space<vmem>>, vector<1x8x4xbf16>
    %44 = vector.shape_cast %43 : vector<1x8x4xbf16> to vector<8x4xbf16>
    %cst_21 = arith.constant dense<0.000000e+00> : vector<8x128xf32>
    %45 = tpu.matmul %44, %42, %cst_21 {dimension_numbers = #tpu.dot_dimension_numbers<[1], [0], [0], [1], [0, 0, 1, 1], [], []>} : vector<8x4xbf16>, vector<4x128xbf16>, vector<8x128xf32> -> vector<8x128xf32>
    %46 = arith.addf %36, %45 : vector<8x128xf32>
    %c1_i32_22 = arith.constant 1 : i32
    %47 = tpu.dynamic_rotate %29 by %c1_i32_22 dim 1 : vector<4x128xf32>, i32 -> vector<4x128xf32>
    %cst_23 = arith.constant 0.000000e+00 : f32
    %48 = vector.shape_cast %20 : vector<1x128xi1> to vector<1x128xi1>
    %49 = vector.broadcast %48 : vector<1x128xi1> to vector<4x128xi1>
    %50 = vector.broadcast %cst_23 : f32 to vector<4x128xf32>
    %51 = arith.select %49, %47, %50 : vector<4x128xi1>, vector<4x128xf32>
    %52 = arith.truncf %51 : vector<4x128xf32> to vector<4x128xbf16>
    %c1_24 = arith.constant 1 : index
    %c0_25 = arith.constant 0 : index
    %c0_26 = arith.constant 0 : index
    %53 = vector.load %arg2[%c1_24, %c0_25, %c0_26] : memref<5x8x4xbf16, #tpu.memory_space<vmem>>, vector<1x8x4xbf16>
    %54 = vector.shape_cast %53 : vector<1x8x4xbf16> to vector<8x4xbf16>
    %cst_27 = arith.constant dense<0.000000e+00> : vector<8x128xf32>
    %55 = tpu.matmul %54, %52, %cst_27 {dimension_numbers = #tpu.dot_dimension_numbers<[1], [0], [0], [1], [0, 0, 1, 1], [], []>} : vector<8x4xbf16>, vector<4x128xbf16>, vector<8x128xf32> -> vector<8x128xf32>
    %56 = arith.addf %46, %55 : vector<8x128xf32>
    %c127_i32 = arith.constant 127 : i32
    %57 = tpu.dynamic_rotate %29 by %c127_i32 dim 1 : vector<4x128xf32>, i32 -> vector<4x128xf32>
    %cst_28 = arith.constant 0.000000e+00 : f32
    %58 = vector.shape_cast %22 : vector<1x128xi1> to vector<1x128xi1>
    %59 = vector.broadcast %58 : vector<1x128xi1> to vector<4x128xi1>
    %60 = vector.broadcast %cst_28 : f32 to vector<4x128xf32>
    %61 = arith.select %59, %57, %60 : vector<4x128xi1>, vector<4x128xf32>
    %62 = arith.truncf %61 : vector<4x128xf32> to vector<4x128xbf16>
    %c3_29 = arith.constant 3 : index
    %c0_30 = arith.constant 0 : index
    %c0_31 = arith.constant 0 : index
    %63 = vector.load %arg2[%c3_29, %c0_30, %c0_31] : memref<5x8x4xbf16, #tpu.memory_space<vmem>>, vector<1x8x4xbf16>
    %64 = vector.shape_cast %63 : vector<1x8x4xbf16> to vector<8x4xbf16>
    %cst_32 = arith.constant dense<0.000000e+00> : vector<8x128xf32>
    %65 = tpu.matmul %64, %62, %cst_32 {dimension_numbers = #tpu.dot_dimension_numbers<[1], [0], [0], [1], [0, 0, 1, 1], [], []>} : vector<8x4xbf16>, vector<4x128xbf16>, vector<8x128xf32> -> vector<8x128xf32>
    %66 = arith.addf %56, %65 : vector<8x128xf32>
    %c126_i32_33 = arith.constant 126 : i32
    %67 = tpu.dynamic_rotate %29 by %c126_i32_33 dim 1 : vector<4x128xf32>, i32 -> vector<4x128xf32>
    %cst_34 = arith.constant 0.000000e+00 : f32
    %68 = vector.shape_cast %24 : vector<1x128xi1> to vector<1x128xi1>
    %69 = vector.broadcast %68 : vector<1x128xi1> to vector<4x128xi1>
    %70 = vector.broadcast %cst_34 : f32 to vector<4x128xf32>
    %71 = arith.select %69, %67, %70 : vector<4x128xi1>, vector<4x128xf32>
    %72 = arith.truncf %71 : vector<4x128xf32> to vector<4x128xbf16>
    %c4 = arith.constant 4 : index
    %c0_35 = arith.constant 0 : index
    %c0_36 = arith.constant 0 : index
    %73 = vector.load %arg2[%c4, %c0_35, %c0_36] : memref<5x8x4xbf16, #tpu.memory_space<vmem>>, vector<1x8x4xbf16>
    %74 = vector.shape_cast %73 : vector<1x8x4xbf16> to vector<8x4xbf16>
    %cst_37 = arith.constant dense<0.000000e+00> : vector<8x128xf32>
    %75 = tpu.matmul %74, %72, %cst_37 {dimension_numbers = #tpu.dot_dimension_numbers<[1], [0], [0], [1], [0, 0, 1, 1], [], []>} : vector<8x4xbf16>, vector<4x128xbf16>, vector<8x128xf32> -> vector<8x128xf32>
    %76 = arith.addf %66, %75 : vector<8x128xf32>
    %77 = vector.broadcast %25 : vector<8x1xf32> to vector<8x128xf32>
    %78 = arith.addf %76, %77 : vector<8x128xf32>
    %cst_38 = arith.constant dense<0.000000e+00> : vector<128xf32>
    %79 = vector.multi_reduction <add>, %78, %cst_38 [0] : vector<8x128xf32> to vector<128xf32>
    %80 = vector.shape_cast %79 : vector<128xf32> to vector<1x128xf32>
    %81 = arith.mulf %78, %78 : vector<8x128xf32>
    %cst_39 = arith.constant dense<0.000000e+00> : vector<128xf32>
    %82 = vector.multi_reduction <add>, %81, %cst_39 [0] : vector<8x128xf32> to vector<128xf32>
    %83 = vector.shape_cast %82 : vector<128xf32> to vector<1x128xf32>
    %84 = vector.shape_cast %80 : vector<1x128xf32> to vector<1x1x128xf32>
    %cst_40 = arith.constant dense<0.000000e+00> : vector<1xf32>
    %85 = vector.multi_reduction <add>, %84, %cst_40 [1, 2] : vector<1x1x128xf32> to vector<1xf32>
    %86 = vector.shape_cast %85 : vector<1xf32> to vector<1x1x1xf32>
    %87 = vector.extract %86[0, 0, 0] : f32 from vector<1x1x1xf32>
    %cst_41 = arith.constant 1.024000e+03 : f32
    %88 = arith.divf %87, %cst_41 : f32
    %89 = vector.shape_cast %83 : vector<1x128xf32> to vector<1x1x128xf32>
    %cst_42 = arith.constant dense<0.000000e+00> : vector<1xf32>
    %90 = vector.multi_reduction <add>, %89, %cst_42 [1, 2] : vector<1x1x128xf32> to vector<1xf32>
    %91 = vector.shape_cast %90 : vector<1xf32> to vector<1x1x1xf32>
    %92 = vector.extract %91[0, 0, 0] : f32 from vector<1x1x1xf32>
    %cst_43 = arith.constant 1.024000e+03 : f32
    %93 = arith.divf %92, %cst_43 : f32
    %94 = arith.mulf %88, %88 : f32
    %95 = arith.subf %93, %94 : f32
    %cst_44 = arith.constant 9.99999974E-6 : f32
    %96 = arith.addf %95, %cst_44 : f32
    %97 = math.rsqrt %96 : f32
    %98 = arith.mulf %88, %97 : f32
    %99 = vector.broadcast %97 : f32 to vector<8x128xf32>
    %100 = arith.mulf %78, %99 : vector<8x128xf32>
    %101 = vector.broadcast %98 : f32 to vector<8x128xf32>
    %102 = arith.subf %100, %101 : vector<8x128xf32>
    %103 = vector.broadcast %26 : vector<8x1xf32> to vector<8x128xf32>
    %104 = arith.mulf %103, %102 : vector<8x128xf32>
    %105 = vector.broadcast %27 : vector<8x1xf32> to vector<8x128xf32>
    %106 = arith.addf %104, %105 : vector<8x128xf32>
    %cst_45 = arith.constant 5.000000e-01 : f32
    %107 = vector.broadcast %cst_45 : f32 to vector<8x128xf32>
    %108 = arith.mulf %107, %106 : vector<8x128xf32>
    %cst_46 = arith.constant 1.41421354 : f32
    %109 = vector.broadcast %cst_46 : f32 to vector<8x128xf32>
    %110 = arith.divf %106, %109 : vector<8x128xf32>
    %111 = math.erf %110 : vector<8x128xf32>
    %cst_47 = arith.constant 1.000000e+00 : f32
    %112 = vector.broadcast %cst_47 : f32 to vector<8x128xf32>
    %113 = arith.addf %112, %111 : vector<8x128xf32>
    %114 = arith.mulf %108, %113 : vector<8x128xf32>
    %c2_48 = arith.constant 2 : index
    %c0_49 = arith.constant 0 : index
    %c0_50 = arith.constant 0 : index
    %115 = vector.load %arg3[%c2_48, %c0_49, %c0_50] : memref<5x8x8xbf16, #tpu.memory_space<vmem>>, vector<1x8x8xbf16>
    %116 = vector.shape_cast %115 : vector<1x8x8xbf16> to vector<8x8xbf16>
    %117 = arith.truncf %114 : vector<8x128xf32> to vector<8x128xbf16>
    %cst_51 = arith.constant dense<0.000000e+00> : vector<8x128xf32>
    %118 = tpu.matmul %116, %117, %cst_51 {dimension_numbers = #tpu.dot_dimension_numbers<[1], [0], [0], [1], [0, 0, 1, 1], [], []>} : vector<8x8xbf16>, vector<8x128xbf16>, vector<8x128xf32> -> vector<8x128xf32>
    %c2_i32_52 = arith.constant 2 : i32
    %119 = tpu.dynamic_rotate %114 by %c2_i32_52 dim 1 : vector<8x128xf32>, i32 -> vector<8x128xf32>
    %cst_53 = arith.constant 0.000000e+00 : f32
    %120 = vector.shape_cast %18 : vector<1x128xi1> to vector<1x128xi1>
    %121 = vector.broadcast %120 : vector<1x128xi1> to vector<8x128xi1>
    %122 = vector.broadcast %cst_53 : f32 to vector<8x128xf32>
    %123 = arith.select %121, %119, %122 : vector<8x128xi1>, vector<8x128xf32>
    %124 = arith.truncf %123 : vector<8x128xf32> to vector<8x128xbf16>
    %c0_54 = arith.constant 0 : index
    %c0_55 = arith.constant 0 : index
    %c0_56 = arith.constant 0 : index
    %125 = vector.load %arg3[%c0_54, %c0_55, %c0_56] : memref<5x8x8xbf16, #tpu.memory_space<vmem>>, vector<1x8x8xbf16>
    %126 = vector.shape_cast %125 : vector<1x8x8xbf16> to vector<8x8xbf16>
    %cst_57 = arith.constant dense<0.000000e+00> : vector<8x128xf32>
    %127 = tpu.matmul %126, %124, %cst_57 {dimension_numbers = #tpu.dot_dimension_numbers<[1], [0], [0], [1], [0, 0, 1, 1], [], []>} : vector<8x8xbf16>, vector<8x128xbf16>, vector<8x128xf32> -> vector<8x128xf32>
    %128 = arith.addf %118, %127 : vector<8x128xf32>
    %c1_i32_58 = arith.constant 1 : i32
    %129 = tpu.dynamic_rotate %114 by %c1_i32_58 dim 1 : vector<8x128xf32>, i32 -> vector<8x128xf32>
    %cst_59 = arith.constant 0.000000e+00 : f32
    %130 = vector.shape_cast %20 : vector<1x128xi1> to vector<1x128xi1>
    %131 = vector.broadcast %130 : vector<1x128xi1> to vector<8x128xi1>
    %132 = vector.broadcast %cst_59 : f32 to vector<8x128xf32>
    %133 = arith.select %131, %129, %132 : vector<8x128xi1>, vector<8x128xf32>
    %134 = arith.truncf %133 : vector<8x128xf32> to vector<8x128xbf16>
    %c1_60 = arith.constant 1 : index
    %c0_61 = arith.constant 0 : index
    %c0_62 = arith.constant 0 : index
    %135 = vector.load %arg3[%c1_60, %c0_61, %c0_62] : memref<5x8x8xbf16, #tpu.memory_space<vmem>>, vector<1x8x8xbf16>
    %136 = vector.shape_cast %135 : vector<1x8x8xbf16> to vector<8x8xbf16>
    %cst_63 = arith.constant dense<0.000000e+00> : vector<8x128xf32>
    %137 = tpu.matmul %136, %134, %cst_63 {dimension_numbers = #tpu.dot_dimension_numbers<[1], [0], [0], [1], [0, 0, 1, 1], [], []>} : vector<8x8xbf16>, vector<8x128xbf16>, vector<8x128xf32> -> vector<8x128xf32>
    %138 = arith.addf %128, %137 : vector<8x128xf32>
    %c127_i32_64 = arith.constant 127 : i32
    %139 = tpu.dynamic_rotate %114 by %c127_i32_64 dim 1 : vector<8x128xf32>, i32 -> vector<8x128xf32>
    %cst_65 = arith.constant 0.000000e+00 : f32
    %140 = vector.shape_cast %22 : vector<1x128xi1> to vector<1x128xi1>
    %141 = vector.broadcast %140 : vector<1x128xi1> to vector<8x128xi1>
    %142 = vector.broadcast %cst_65 : f32 to vector<8x128xf32>
    %143 = arith.select %141, %139, %142 : vector<8x128xi1>, vector<8x128xf32>
    %144 = arith.truncf %143 : vector<8x128xf32> to vector<8x128xbf16>
    %c3_66 = arith.constant 3 : index
    %c0_67 = arith.constant 0 : index
    %c0_68 = arith.constant 0 : index
    %145 = vector.load %arg3[%c3_66, %c0_67, %c0_68] : memref<5x8x8xbf16, #tpu.memory_space<vmem>>, vector<1x8x8xbf16>
    %146 = vector.shape_cast %145 : vector<1x8x8xbf16> to vector<8x8xbf16>
    %cst_69 = arith.constant dense<0.000000e+00> : vector<8x128xf32>
    %147 = tpu.matmul %146, %144, %cst_69 {dimension_numbers = #tpu.dot_dimension_numbers<[1], [0], [0], [1], [0, 0, 1, 1], [], []>} : vector<8x8xbf16>, vector<8x128xbf16>, vector<8x128xf32> -> vector<8x128xf32>
    %148 = arith.addf %138, %147 : vector<8x128xf32>
    %c126_i32_70 = arith.constant 126 : i32
    %149 = tpu.dynamic_rotate %114 by %c126_i32_70 dim 1 : vector<8x128xf32>, i32 -> vector<8x128xf32>
    %cst_71 = arith.constant 0.000000e+00 : f32
    %150 = vector.shape_cast %24 : vector<1x128xi1> to vector<1x128xi1>
    %151 = vector.broadcast %150 : vector<1x128xi1> to vector<8x128xi1>
    %152 = vector.broadcast %cst_71 : f32 to vector<8x128xf32>
    %153 = arith.select %151, %149, %152 : vector<8x128xi1>, vector<8x128xf32>
    %154 = arith.truncf %153 : vector<8x128xf32> to vector<8x128xbf16>
    %c4_72 = arith.constant 4 : index
    %c0_73 = arith.constant 0 : index
    %c0_74 = arith.constant 0 : index
    %155 = vector.load %arg3[%c4_72, %c0_73, %c0_74] : memref<5x8x8xbf16, #tpu.memory_space<vmem>>, vector<1x8x8xbf16>
    %156 = vector.shape_cast %155 : vector<1x8x8xbf16> to vector<8x8xbf16>
    %cst_75 = arith.constant dense<0.000000e+00> : vector<8x128xf32>
    %157 = tpu.matmul %156, %154, %cst_75 {dimension_numbers = #tpu.dot_dimension_numbers<[1], [0], [0], [1], [0, 0, 1, 1], [], []>} : vector<8x8xbf16>, vector<8x128xbf16>, vector<8x128xf32> -> vector<8x128xf32>
    %158 = arith.addf %148, %157 : vector<8x128xf32>
    %159 = vector.broadcast %28 : vector<8x1xf32> to vector<8x128xf32>
    %160 = arith.addf %158, %159 : vector<8x128xf32>
    %c0_76 = arith.constant 0 : index
    %c4_77 = arith.constant 4 : index
    %161 = vector.load %arg4[%c0_76, %c4_77] : memref<8x8xf32, #tpu.memory_space<vmem>>, vector<8x1xf32>
    %c0_78 = arith.constant 0 : index
    %c5 = arith.constant 5 : index
    %162 = vector.load %arg4[%c0_78, %c5] : memref<8x8xf32, #tpu.memory_space<vmem>>, vector<8x1xf32>
    %cst_79 = arith.constant dense<0.000000e+00> : vector<128xf32>
    %163 = vector.multi_reduction <add>, %160, %cst_79 [0] : vector<8x128xf32> to vector<128xf32>
    %164 = vector.shape_cast %163 : vector<128xf32> to vector<1x128xf32>
    %165 = arith.mulf %160, %160 : vector<8x128xf32>
    %cst_80 = arith.constant dense<0.000000e+00> : vector<128xf32>
    %166 = vector.multi_reduction <add>, %165, %cst_80 [0] : vector<8x128xf32> to vector<128xf32>
    %167 = vector.shape_cast %166 : vector<128xf32> to vector<1x128xf32>
    %168 = vector.shape_cast %164 : vector<1x128xf32> to vector<1x1x128xf32>
    %cst_81 = arith.constant dense<0.000000e+00> : vector<1xf32>
    %169 = vector.multi_reduction <add>, %168, %cst_81 [1, 2] : vector<1x1x128xf32> to vector<1xf32>
    %170 = vector.shape_cast %169 : vector<1xf32> to vector<1x1x1xf32>
    %171 = vector.extract %170[0, 0, 0] : f32 from vector<1x1x1xf32>
    %cst_82 = arith.constant 1.024000e+03 : f32
    %172 = arith.divf %171, %cst_82 : f32
    %173 = vector.shape_cast %167 : vector<1x128xf32> to vector<1x1x128xf32>
    %cst_83 = arith.constant dense<0.000000e+00> : vector<1xf32>
    %174 = vector.multi_reduction <add>, %173, %cst_83 [1, 2] : vector<1x1x128xf32> to vector<1xf32>
    %175 = vector.shape_cast %174 : vector<1xf32> to vector<1x1x1xf32>
    %176 = vector.extract %175[0, 0, 0] : f32 from vector<1x1x1xf32>
    %cst_84 = arith.constant 1.024000e+03 : f32
    %177 = arith.divf %176, %cst_84 : f32
    %178 = arith.mulf %172, %172 : f32
    %179 = arith.subf %177, %178 : f32
    %cst_85 = arith.constant 9.99999974E-6 : f32
    %180 = arith.addf %179, %cst_85 : f32
    %181 = math.rsqrt %180 : f32
    %182 = arith.mulf %172, %181 : f32
    %183 = vector.broadcast %181 : f32 to vector<8x128xf32>
    %184 = arith.mulf %160, %183 : vector<8x128xf32>
    %185 = vector.broadcast %182 : f32 to vector<8x128xf32>
    %186 = arith.subf %184, %185 : vector<8x128xf32>
    %187 = vector.broadcast %161 : vector<8x1xf32> to vector<8x128xf32>
    %188 = arith.mulf %187, %186 : vector<8x128xf32>
    %189 = vector.broadcast %162 : vector<8x1xf32> to vector<8x128xf32>
    %190 = arith.addf %188, %189 : vector<8x128xf32>
    %cst_86 = arith.constant 5.000000e-01 : f32
    %191 = vector.broadcast %cst_86 : f32 to vector<8x128xf32>
    %192 = arith.mulf %191, %190 : vector<8x128xf32>
    %cst_87 = arith.constant 1.41421354 : f32
    %193 = vector.broadcast %cst_87 : f32 to vector<8x128xf32>
    %194 = arith.divf %190, %193 : vector<8x128xf32>
    %195 = math.erf %194 : vector<8x128xf32>
    %cst_88 = arith.constant 1.000000e+00 : f32
    %196 = vector.broadcast %cst_88 : f32 to vector<8x128xf32>
    %197 = arith.addf %196, %195 : vector<8x128xf32>
    %198 = arith.mulf %192, %197 : vector<8x128xf32>
    %199 = arith.addf %198, %32 : vector<8x128xf32>
    %c0_89 = arith.constant 0 : index
    %c0_90 = arith.constant 0 : index
    %200 = vector.load %arg6[%c0_89, %c0_90] : memref<8x128xf32, #tpu.memory_space<vmem>>, vector<8x128xf32>
    tpu.vector_store %arg6[%c0_89, %c0_90], %199 {strides = array<i32>} : memref<8x128xf32, #tpu.memory_space<vmem>>, vector<8x128xf32>,
    return
  }
  func.func @transform_0(%arg0: i32) -> (i32, i32) {
    %c0_i32 = arith.constant 0 : i32
    %c0_i32_0 = arith.constant 0 : i32
    return %c0_i32, %arg0 : i32, i32
  }
  func.func @transform_1(%arg0: i32) -> (i32, i32, i32) {
    %c0_i32 = arith.constant 0 : i32
    %c0_i32_0 = arith.constant 0 : i32
    %c0_i32_1 = arith.constant 0 : i32
    %c0_i32_2 = arith.constant 0 : i32
    return %c0_i32, %c0_i32_0, %c0_i32_1 : i32, i32, i32
  }
  func.func @transform_2(%arg0: i32) -> (i32, i32, i32) {
    %c0_i32 = arith.constant 0 : i32
    %c0_i32_0 = arith.constant 0 : i32
    %c0_i32_1 = arith.constant 0 : i32
    %c0_i32_2 = arith.constant 0 : i32
    return %c0_i32, %c0_i32_0, %c0_i32_1 : i32, i32, i32
  }
  func.func @transform_3(%arg0: i32) -> (i32, i32) {
    %c0_i32 = arith.constant 0 : i32
    %c0_i32_0 = arith.constant 0 : i32
    %c0_i32_1 = arith.constant 0 : i32
    return %c0_i32, %c0_i32_0 : i32, i32
  }
  func.func @transform_4(%arg0: i32) -> (i32, i32) {
    %c0_i32 = arith.constant 0 : i32
    %c0_i32_0 = arith.constant 0 : i32
    %c0_i32_1 = arith.constant 0 : i32
    return %c0_i32, %c0_i32_0 : i32, i32
  }
  func.func @transform_5(%arg0: i32) -> (i32, i32) {
    %c0_i32 = arith.constant 0 : i32
    %c0_i32_0 = arith.constant 0 : i32
    return %c0_i32, %arg0 : i32, i32
  }
}

</mosaic_0001>

<bundles_post_ra>
// kernel: tpu_custom_call.1
= control target key start
LH: loop header
LB: loop body
LE: loop exit
PB: predicated region body
PF: predicated region fallthrough
CT: control target
= control target key end

     0   :  { %10 = vsyncpa [#allocation3], 0  ;;  %s1301_s0 = inlined_call_operand.vmem [shape: f32[4,256], index: 0, kind: input, shape index: {}]   ;;  %s1302_s1 = inlined_call_operand.vmem [shape: bf16[5,8,4], index: 1, kind: input, shape index: {}]   ;;  %s1303_s2 = inlined_call_operand.vmem [shape: bf16[5,8,8], index: 2, kind: input, shape index: {}]   ;;  %s1304_s3 = inlined_call_operand.vmem [shape: f32[8,8], index: 3, kind: input, shape index: {}]   ;;  %s1305_s4 = inlined_call_operand.vmem [shape: bf16[8,4], index: 4, kind: input, shape index: {}]   ;;  %s1306_s5 = inlined_call_operand.hbm [shape: f32[8,256], index: 5, kind: output, shape index: {}]  }
   0x1   :  { %12 = vsyncpa [#allocation3 + $0x1], 0  ;;  %s1085_s18 = smov 0   ;;  %s1087_s19 = smov 0  }
   0x2   :  { %s1089_s20 = smov 0   ;;  %s1091_s21 = smov 0  }
   0x3 LB: > { %s1106_s22 = sadd.s32 4294967295, %s1041_s21   ;;  %s864_s23 = sadd.s32 4294967294, %s1041_s21   ;;  %s1041_s21 = sphi %s1091_s21, %s1312_s21   ;;  %s1037_s20 = sphi %s1089_s20, %s1311_s20   ;;  %s1033_s19 = sphi %s1087_s19, %s1310_s19   ;;  %s1029_s18 = sphi %s1085_s18, %s1309_s18  }
   0x4   : > { %s1110_s24 = sadd.s32 1, %s1041_s21   ;;  %s135_s25 = sadd.s32 1, %s1037_s20 }
   0x5   : > { %s132_s26 = ssub.s32 %s1041_s21, %s1110_s24  ;;  %p145_p0 = scmp.ne.s32.totalorder %s1037_s20, %s1033_s19 }
   0x6   : > { %p133_p1 = scmp.eq.s32.totalorder %s132_s26, 0  ;;  %p146_p2 = scmp.eq.s32.totalorder %s1106_s22, 1 }
   0x7   : > { %p151_p3 = scmp.ne.s32.totalorder %s1033_s19, %s1029_s18  ;;  %p152_p4 = scmp.eq.s32.totalorder %s864_s23, 1 }
   0x8   : > { %s1121_s27 = scalar_select %p133_p1, %s1037_s20, %s135_s25  }
   0x9   : > { %p1123_p5 = por %p146_p2, %p145_p0  ;;  %p1127_p6 = por %p152_p4, %p151_p3 }
   0xa   : > { %p867_p7 = scmp.ge.s32.totalorder %s1041_s21, 1  ;;  %p189_p8 = scmp.lt.s32.totalorder %s1041_s21, 3 }
   0xc   : > { %p190_p9 = pnand %p867_p7, %p189_p8 }
   0xd   : > { %p216_p10 = scmp.lt.s32.totalorder (!%p190_p9), %s1106_s22, 1  ;;  %s1043_s10 = smov (!%p190_p9), 2  }
   0xe   : > { %193 = sbr.rel (%p190_p9) target bundleno = 1231 (0x4cf), region = 40  ;;  %s1044_s11 = smov (!%p190_p9), 127  }
   0xf   : > { %s1045_s12 = smov (!%p190_p9), 1   ;;  %s1046_s13 = smov (!%p190_p9), 126  }
  0x13   : > { %s217_s30 = scalar_select %p216_p10, %s1106_s22, 1  ;;  %vm247_vm0 = vcmask 1041408   ;;  %v241_v3 = vld [vmem:[%s1305_s4] sm:$0xf]  ;;  %vm243_vm1 = vcmask 31744   ;;  %v221_v5 = vlaneseq  ;;  %v1047_v7 = vmov 0  }
  0x14   : > { %v871_v4 = vld [vmem:[%s1302_s1 + $0x8] sm:$0xf]  ;;  %v1154_v6 = vld [vmem:[%s1304_s3] sm:$0xff]  ;;  %960 = vset.pattern.permute.xlu2 %v1047_v7  ;;  %v876_v18 = vld [vmem:[%s1302_s1 + $0xc] sm:$0xf]  ;;  %vm411_vm6 = vcmask 1040384  }
  0x15   : > { %s869_s6 = sshll.u32 %s217_s30, 2  ;;  %v1156_v8 = vand.u32 127, %v221_v5  ;;  %394 = vperm.xlu2 %960, %v1154_v6   ;;  %v272_v17 = vld [vmem:[%s1302_s1] sm:$0xf]  ;;  %v874_v27 = vld [vmem:[%s1302_s1 + $0x4] sm:$0xf] }
  0x16   : > { %s219_s9 = scalar_lea.vmem %s1301_s0, %s869_s6  ;;  %v878_v28 = vld [vmem:[%s1302_s1 + $0x10] sm:$0xf]  ;;  %v1048_v62 = vmov 1   ;;  %v1049_v63 = vmov 1024.0  }
  0x17   : > { %v240_v0 = vld [vmem:[%s219_s9] sm:$0xf]  ;;  %vm235_vm2 = vcmp.ge.s32.totalorder %v1156_v8, 2  ;;  %vm237_vm3 = vcmp.le.s32.totalorder %v1156_v8, 126  ;;  %vm236_vm4 = vcmp.ge.s32.totalorder %v1156_v8, 1  ;;  %vm238_vm5 = vcmp.le.s32.totalorder %v1156_v8, 125  ;;  %961 = vset.pattern.permute.xlu1 %v1048_v62 }
  0x18   : > { %266 = vrot.lane.b32.xlu0 %v240_v0, %s1043_s10  ;;  %336 = vrot.lane.b32.xlu1 %v240_v0, %s1044_s11  ;;  %v242_v1 = vpack.c.bf16 %v240_v0, %v240_v0  ;;  %967 = vrcp.f32 %v1049_v63 }
  0x1a   : > { %v249_v2 = vsel %vm247_vm0, %v242_v1, 0  ;;  %v1050_v1 = vmov 2  }
  0x1b   : > { %258 = vmatpush.bf16.msra.mxu0 %v249_v2  ;;  %302 = vmatpush.bf16.msra.mxu2 %v249_v2 }
  0x1e   : > { %870 = vmatmul.msk.bf16.vlgmr.msra.gmra.mxu0 %vm243_vm1, %v241_v3  ;;  %873 = vmatmul.msk.bf16.vlgmr.msra.gmra.mxu2 %vm243_vm1, %v871_v4 }
  0x20   : > { %308 = vrot.lane.b32.xlu0 %v240_v0, %s1045_s12  ;;  %364 = vrot.lane.b32.xlu1 %v240_v0, %s1046_s13  ;;  %v968_v0 = vpop.eup %967 }
  0x21   : > { %v423_v2 = vmul.f32 1024.0, %v968_v0  ;;  %vm427_vm7 = vweird.f32 %v968_v0 }
  0x23   : > { %v424_v3 = vsub.f32 1.0, %v423_v2 }
  0x28   : > { %471 = vperm.xlu1 %961, %v1154_v6  }
  0x30   : > { %962 = vset.pattern.permute.xlu1 %v1050_v1 }
  0x31   : > { %476 = vperm.xlu1 %962, %v1154_v6  }
  0x6f   : > { %v395_v42 = vpop.permute.xlu2 %394 }
  0x8a   : > { %v267_v9 = vpop.permute.xlu0 %266  ;;  %v337_v10 = vpop.permute.xlu1 %336 }
  0x8b   : > { %v270_v11 = vsel %vm235_vm2, %v267_v9, 0.0  ;;  %v340_v12 = vsel %vm237_vm3, %v337_v10, 0.0 }
  0x8c   : > { %v271_v13 = vpack.c.bf16 %v270_v11, %v270_v11  ;;  %v341_v14 = vpack.c.bf16 %v340_v12, %v340_v12  ;;  %v425_v11 = vmul.f32 %v968_v0, %v424_v3 }
  0x8e   : > { %v277_v15 = vsel %vm247_vm0, %v271_v13, 0  ;;  %v348_v16 = vsel %vm247_vm0, %v341_v14, 0 }
  0x8f   : > { %286 = vmatpush.bf16.msra.mxu1 %v277_v15  ;;  %357 = vmatpush.bf16.msrb.mxu0 %v348_v16  ;;  %v426_v16 = vadd.f32 %v968_v0, %v425_v11 }
  0x92   : > { %872 = vmatmul.msk.bf16.vlgmr.msra.gmra.mxu1 %vm243_vm1, %v272_v17  ;;  %v309_v19 = vpop.permute.xlu0 %308  ;;  %v365_v20 = vpop.permute.xlu1 %364  ;;  %877 = vmatmul.msk.bf16.vlgmr.msrb.gmra.mxu0 %vm243_vm1, %v876_v18 }
  0x93   : > { %v312_v21 = vsel %vm236_vm4, %v309_v19, 0.0  ;;  %v368_v22 = vsel %vm238_vm5, %v365_v20, 0.0  ;;  %v428_v20 = vsel %vm427_vm7, %v968_v0, %v426_v16 }
  0x94   : > { %v313_v23 = vpack.c.bf16 %v312_v21, %v312_v21  ;;  %v369_v24 = vpack.c.bf16 %v368_v22, %v368_v22 }
  0x96   : > { %v320_v25 = vsel %vm247_vm0, %v313_v23, 0  ;;  %v376_v26 = vsel %vm247_vm0, %v369_v24, 0  ;;  %vm543_vm0 = vcmask 1043456  }
  0x97   : > { %329 = vmatpush.bf16.msra.mxu3 %v320_v25  ;;  %385 = vmatpush.bf16.msrb.mxu1 %v376_v26 }
  0x9a   : > { %875 = vmatmul.msk.bf16.vlgmr.msra.gmra.mxu3 %vm243_vm1, %v874_v27 }
  0x9b   : > { %v1191_v29 = vpop.f32.mrf.mxu0 }
  0xa1   : > { %v304_v31 = vpop.f32.mrf.mxu2 }
  0xa2   : > { %879 = vmatmul.msk.bf16.vlgmr.msrb.gmra.mxu1 %vm243_vm1, %v878_v28  ;;  %vm539_vm1 = vcmask 64512  }
  0xa3   : > { %v262_v30 = vpop.f32.mrf.mxu0 }
  0xa9   : > { %v306_v32 = vpop.f32.mrf.mxu2 }
  0xaa   : > { %v1051_v32 = vmov 1.4142135  }
 0x10f   : > { %v288_v33 = vpop.f32.mrf.mxu1  ;;  %v359_v34 = vpop.f32.mrf.mxu0 }
 0x110   : > { %v305_v37 = vadd.f32 %v304_v31, %v288_v33 }
 0x117   : > { %v290_v35 = vpop.f32.mrf.mxu1  ;;  %v361_v36 = vpop.f32.mrf.mxu0 }
 0x118   : > { %v472_v35 = vpop.permute.xlu1 %471 }
 0x11d   : > { %v331_v38 = vpop.f32.mrf.mxu3 }
 0x11e   : > { %v335_v39 = vadd.f32 %v331_v38, %v305_v37 }
 0x11f   : > { %v387_v40 = vpop.f32.mrf.mxu1 }
 0x120   : > { %v363_v41 = vadd.f32 %v359_v34, %v335_v39 }
 0x122   : > { %v391_v43 = vadd.f32 %v387_v40, %v363_v41 }
 0x124   : > { %v1193_v44 = vadd.f32 %v395_v42, %v391_v43  ;;  %v477_v43 = vpop.permute.xlu1 %476 }
 0x125   : > { %v333_v45 = vpop.f32.mrf.mxu3 }
 0x126   : > { %v398_v46 = vrot.slane %v1193_v44, 4  ;;  %v404_v47 = vmul.f32 %v1193_v44, %v1193_v44 }
 0x127   : > { %v389_v48 = vpop.f32.mrf.mxu1 }
 0x128   : > { %v399_v49 = vadd.f32 %v398_v46, %v1193_v44  ;;  %v405_v50 = vrot.slane %v404_v47, 4 }
 0x12a   : > { %v400_v51 = vrot.slane %v399_v49, 2  ;;  %v406_v52 = vadd.f32 %v405_v50, %v404_v47 }
 0x12c   : > { %v401_v53 = vadd.f32 %v400_v51, %v399_v49  ;;  %v407_v54 = vrot.slane %v406_v52, 2 }
 0x12e   : > { %v402_v55 = vrot.slane %v401_v53, 1  ;;  %v408_v56 = vadd.f32 %v407_v54, %v406_v52 }
 0x130   : > { %v403_v57 = vadd.f32 %v402_v55, %v401_v53  ;;  %v409_v58 = vrot.slane %v408_v56, 1 }
 0x132   : > { %v412_v59 = vsel %vm411_vm6, %v403_v57, 0.0  ;;  %v410_v60 = vadd.f32 %v409_v58, %v408_v56 }
 0x133   : > { %413 = vadd.xlane.f32.xlu2 %v412_v59 }
 0x134   : > { %v431_v61 = vsel %vm411_vm6, %v410_v60, 0.0 }
 0x135   : > { %432 = vadd.xlane.f32.xlu0 %v431_v61 }
 0x1a6   : > { %v414_v4 = vpop.xlane.xlu2 %413 }
 0x1a7   : > { %v415_v5 = vrot.slane %v414_v4, 4 }
 0x1a8   : > { %v433_v7 = vpop.xlane.xlu0 %432 }
 0x1a9   : > { %v416_v9 = vadd.f32 %v415_v5, %v414_v4  ;;  %v434_v10 = vrot.slane %v433_v7, 4 }
 0x1ab   : > { %v417_v12 = vrot.slane %v416_v9, 2  ;;  %v435_v13 = vadd.f32 %v434_v10, %v433_v7 }
 0x1ad   : > { %v436_v14 = vrot.slane %v435_v13, 2  ;;  %v418_v15 = vadd.f32 %v417_v12, %v416_v9 }
 0x1af   : > { %v419_v17 = vrot.slane %v418_v15, 1  ;;  %v437_v18 = vadd.f32 %v436_v14, %v435_v13 }
 0x1b1   : > { %v420_v19 = vadd.f32 %v419_v17, %v418_v15  ;;  %v438_v21 = vrot.slane %v437_v18, 1 }
 0x1b3   : > { %895 = vpush %v420_v19  ;;  %v439_v22 = vadd.f32 %v438_v21, %v437_v18 }
 0x1b4   : > { %897 = vpush %v428_v20 }
 0x1b5   : > { %899 = vpush %v439_v22 }
 0x1e4   : > { %s896_s16 = spop %895 }
 0x1e5   : > { %s1203_s17 = spop %897 }
 0x1e6   : > { %s1206_s23 = smul.f32 %s1203_s17, %s896_s16  ;;  %s900_s25 = spop %899 }
 0x1e7   : > { %s449_s26 = smul.f32 %s900_s25, %s1203_s17 }
 0x1e8   : > { %s450_s30 = smul.f32 %s1206_s23, %s1206_s23 }
 0x1ea   : > { %s451_s6 = ssub.f32 %s449_s26, %s450_s30 }
 0x1ec   : > { %s452_s7 = sadd.f32 1e-05, %s451_s6 }
 0x1ee   : > { %v453_v23 = vstv %s452_s7 }
 0x1ef   : > { %969 = vrsqrt.f32 %v453_v23  ;;  %vm460_vm9 = vweird.f32 %v453_v23 }
 0x1f0   : > { %971 = vrcp.f32 %v1051_v32  ;;  %v886_v32 = vld [vmem:[%s1303_s2 + $0xc] sm:$0xf] }
 0x1f5   : > { %v970_v24 = vpop.eup %969 }
 0x1f6   : > { %v455_v25 = vmul.f32 %v970_v24, %v453_v23  ;;  %vm461_vm8 = vweird.f32 %v970_v24  ;;  %v972_v33 = vpop.eup %971 }
 0x1f7   : > { %vm462_vm10 = vmor %vm460_vm9, %vm461_vm8  ;;  %v482_v34 = vmul.f32 1.4142135, %v972_v33  ;;  %vm486_vm11 = vweird.f32 %v972_v33 }
 0x1f8   : > { %v456_v26 = vmul.f32 %v970_v24, %v455_v25 }
 0x1f9   : > { %v483_v36 = vsub.f32 1.0, %v482_v34 }
 0x1fa   : > { %v457_v27 = vmul.f32 0.5, %v456_v26 }
 0x1fb   : > { %v484_v37 = vmul.f32 %v972_v33, %v483_v36 }
 0x1fc   : > { %v458_v28 = vsub.f32 1.5, %v457_v27  ;;  %v881_v27 = vld [vmem:[%s1303_s2 + $0x8] sm:$0xf] }
 0x1fd   : > { %v485_v41 = vadd.f32 %v972_v33, %v484_v37 }
 0x1fe   : > { %v459_v30 = vmul.f32 %v970_v24, %v458_v28 }
 0x1ff   : > { %v1213_v46 = vsel %vm486_vm11, %v972_v33, %v485_v41  ;;  %v1052_v33 = vmov 3  }
 0x200   : > { %v463_v31 = vsel %vm462_vm10, %v970_v24, %v459_v30  ;;  %963 = vset.pattern.permute.xlu1 %v1052_v33 }
 0x201   : > { %901 = vpush %v463_v31 }
 0x232   : > { %s902_s8 = spop %901 }
 0x233   : > { %s465_s9 = smul.f32 %s902_s8, %s1206_s23  ;;  %v466_v38 = vstv %s902_s8 }
 0x234   : > { %v467_v39 = vmul.f32 %v466_v38, %v1193_v44  ;;  %v538_v38 = vld [vmem:[%s1303_s2] sm:$0xf] }
 0x235   : > { %v468_v40 = vstv %s465_s9 }
 0x236   : > { %v469_v42 = vsub.f32 %v467_v39, %v468_v40 }
 0x238   : > { %v474_v45 = vmul.f32 %v472_v35, %v469_v42 }
 0x23a   : > { %v479_v47 = vadd.f32 %v477_v43, %v474_v45 }
 0x23c   : > { %v488_v48 = vmul.f32 %v1213_v46, %v479_v47  ;;  %v480_v21 = vmul.f32 0.5, %v479_v47 }
 0x23e   : > { %v489_v49 = vmul.f32 %v488_v48, %v488_v48 }
 0x240   : > { %v490_v50 = vmin.f32 %v489_v49, 16.0  ;;  %v888_v49 = vld [vmem:[%s1303_s2 + $0x10] sm:$0xf] }
 0x242   : > { %v491_v51 = vmul.f32 2.1237322e-06, %v490_v50  ;;  %v502_v52 = vmul.f32 3.8918573e-05, %v490_v50 }
 0x244   : > { %v492_v53 = vadd.f32 0.00028619796, %v491_v51  ;;  %v503_v54 = vadd.f32 0.001143296, %v502_v52 }
 0x246   : > { %v493_v55 = vmul.f32 %v492_v53, %v490_v50  ;;  %v504_v56 = vmul.f32 %v503_v54, %v490_v50 }
 0x248   : > { %v505_v44 = vadd.f32 0.014752088, %v504_v56  ;;  %v494_v57 = vadd.f32 0.0036580483, %v493_v55 }
 0x24a   : > { %v506_v58 = vmul.f32 %v505_v44, %v490_v50  ;;  %v495_v60 = vmul.f32 %v494_v57, %v490_v50 }
 0x24c   : > { %v507_v59 = vadd.f32 0.112945676, %v506_v58  ;;  %v496_v63 = vadd.f32 0.05243302, %v495_v60 }
 0x24e   : > { %v508_v61 = vmul.f32 %v507_v59, %v490_v50  ;;  %v497_v2 = vmul.f32 %v496_v63, %v490_v50 }
 0x250   : > { %v509_v62 = vadd.f32 0.4994258, %v508_v61  ;;  %v498_v3 = vadd.f32 0.18741608, %v497_v2 }
 0x252   : > { %v510_v0 = vmul.f32 %v509_v62, %v490_v50  ;;  %v499_v5 = vmul.f32 %v498_v3, %v490_v50  ;;  %v884_v50 = vld [vmem:[%s1303_s2 + $0x4] sm:$0xf] }
 0x254   : > { %v511_v1 = vadd.f32 1.0, %v510_v0  ;;  %v500_v11 = vadd.f32 1.1283791, %v499_v5 }
 0x256   : > { %973 = vrcp.f32 %v511_v1  ;;  %v523_v10 = vand.u32 2147483648, %v511_v1  ;;  %v521_v13 = vand.u32 2147483647, %v511_v1  ;;  %vm517_vm13 = vweird.f32 %v511_v1 }
 0x257   : > { %v501_v16 = vmul.f32 %v500_v11, %v488_v48 }
 0x258   : > { %v524_v15 = vor.u32 1.1754944e-38, %v523_v10  ;;  %vm522_vm15 = vcmp.eq.f32.partialorder %v521_v13, 8.507059e+37 }
 0x25c   : > { %v974_v4 = vpop.eup %973 }
 0x25d   : > { %v513_v7 = vmul.f32 %v974_v4, %v511_v1  ;;  %vm518_vm12 = vweird.f32 %v974_v4 }
 0x25e   : > { %vm519_vm14 = vmor %vm517_vm13, %vm518_vm12 }
 0x25f   : > { %v514_v9 = vsub.f32 1.0, %v513_v7 }
 0x261   : > { %v515_v12 = vmul.f32 %v974_v4, %v514_v9 }
 0x263   : > { %v516_v14 = vadd.f32 %v974_v4, %v515_v12 }
 0x265   : > { %v520_v17 = vsel %vm519_vm14, %v974_v4, %v516_v14 }
 0x266   : > { %v525_v18 = vsel %vm522_vm15, %v524_v15, %v520_v17 }
 0x267   : > { %v526_v19 = vmul.f32 %v525_v18, %v501_v16  ;;  %v1053_v18 = vmov 4  }
 0x268   : > { %964 = vset.pattern.permute.xlu0 %v1053_v18 }
 0x269   : > { %v880_v20 = vclamps-f32 %v526_v19, 1.0  ;;  %v1054_v19 = vmov 5  }
 0x26a   : > { %965 = vset.pattern.permute.xlu2 %v1054_v19 }
 0x26b   : > { %v529_v22 = vadd.f32 1.0, %v880_v20 }
 0x26d   : > { %v530_v23 = vmul.f32 %v529_v22, %v480_v21 }
 0x26f   : > { %605 = vrot.lane.b32.xlu2 %v530_v23, %s1044_s11  ;;  %534 = vrot.lane.b32.xlu1 %v530_v23, %s1043_s10  ;;  %v533_v24 = vpack.c.bf16 %v530_v23, %v530_v23 }
 0x271   : > { %v564_v25 = vsel %vm543_vm0, %v533_v24, 0 }
 0x272   : > { %573 = vmatpush.bf16.msrb.mxu3 %v564_v25 }
 0x275   : > { %883 = vmatmul.msk.bf16.vlgmr.msrb.gmra.mxu3 %vm539_vm1, %v881_v27 }
 0x277   : > { %631 = vrot.lane.b32.xlu1 %v530_v23, %s1046_s13  ;;  %739 = vperm.xlu2 %965, %v1154_v6   ;;  %s892_s13 = sshll.u32 %s1106_s22, 3 }
 0x278   : > { %s800_s25 = scalar_lea.hbm %s1306_s5, %s892_s13 }
 0x27f   : > { %579 = vrot.lane.b32.xlu1 %v530_v23, %s1045_s12 }
 0x287   : > { %658 = vperm.xlu1 %963, %v1154_v6  }
 0x2c9   : > { %v606_v26 = vpop.permute.xlu2 %605 }
 0x2ca   : > { %v607_v28 = vsel %vm237_vm3, %v606_v26, 0.0 }
 0x2cb   : > { %v608_v30 = vpack.c.bf16 %v607_v28, %v607_v28 }
 0x2cd   : > { %v615_v31 = vsel %vm543_vm0, %v608_v30, 0 }
 0x2ce   : > { %624 = vmatpush.bf16.msra.mxu1 %v615_v31 }
 0x2d1   : > { %887 = vmatmul.msk.bf16.vlgmr.msra.gmra.mxu1 %vm539_vm1, %v886_v32 }
 0x2e1   : > { %v535_v34 = vpop.permute.xlu1 %534 }
 0x2e2   : > { %v536_v35 = vsel %vm235_vm2, %v535_v34, 0.0 }
 0x2e3   : > { %v537_v36 = vpack.c.bf16 %v536_v35, %v536_v35 }
 0x2e5   : > { %v545_v37 = vsel %vm543_vm0, %v537_v36, 0 }
 0x2e6   : > { %554 = vmatpush.bf16.msrb.mxu2 %v545_v37 }
 0x2e9   : > { %882 = vmatmul.msk.bf16.vlgmr.msrb.gmra.mxu2 %vm539_vm1, %v538_v38  ;;  %v632_v39 = vpop.permute.xlu1 %631 }
 0x2ea   : > { %v633_v40 = vsel %vm238_vm5, %v632_v39, 0.0 }
 0x2eb   : > { %v634_v41 = vpack.c.bf16 %v633_v40, %v633_v40 }
 0x2ed   : > { %v641_v42 = vsel %vm543_vm0, %v634_v41, 0 }
 0x2ee   : > { %650 = vmatpush.bf16.msra.mxu2 %v641_v42 }
 0x2f1   : > { %v580_v43 = vpop.permute.xlu1 %579 }
 0x2f2   : > { %v581_v45 = vsel %vm236_vm4, %v580_v43, 0.0 }
 0x2f3   : > { %v582_v47 = vpack.c.bf16 %v581_v45, %v581_v45 }
 0x2f5   : > { %v589_v48 = vsel %vm543_vm0, %v582_v47, 0 }
 0x2f6   : > { %598 = vmatpush.bf16.msra.mxu0 %v589_v48 }
 0x2f8   : > { %v575_v51 = vpop.f32.mrf.mxu3 }
 0x2f9   : > { %889 = vmatmul.msk.bf16.vlgmr.msra.gmra.mxu2 %vm539_vm1, %v888_v49  ;;  %885 = vmatmul.msk.bf16.vlgmr.msra.gmra.mxu0 %vm539_vm1, %v884_v50  ;;  %v659_v60 = vpop.permute.xlu1 %658  ;;  %v740_v49 = vpop.permute.xlu2 %739 }
 0x300   : > { %v577_v8 = vpop.f32.mrf.mxu3 }
 0x34e   : > { %v626_v52 = vpop.f32.mrf.mxu1 }
 0x356   : > { %v628_v53 = vpop.f32.mrf.mxu1 }
 0x36c   : > { %v556_v54 = vpop.f32.mrf.mxu2 }
 0x36d   : > { %v576_v56 = vadd.f32 %v575_v51, %v556_v54 }
 0x374   : > { %v558_v55 = vpop.f32.mrf.mxu2 }
 0x376   : > { %v600_v44 = vpop.f32.mrf.mxu0 }
 0x377   : > { %v604_v57 = vadd.f32 %v600_v44, %v576_v56 }
 0x379   : > { %v630_v58 = vadd.f32 %v626_v52, %v604_v57 }
 0x37c   : > { %v652_v59 = vpop.f32.mrf.mxu2 }
 0x37d   : > { %v656_v61 = vadd.f32 %v652_v59, %v630_v58 }
 0x37e   : > { %v602_v62 = vpop.f32.mrf.mxu0 }
 0x37f   : > { %v1254_v63 = vadd.f32 %v659_v60, %v656_v61 }
 0x381   : > { %v662_v0 = vrot.slane %v1254_v63, 4  ;;  %v668_v1 = vmul.f32 %v1254_v63, %v1254_v63 }
 0x383   : > { %v663_v2 = vadd.f32 %v662_v0, %v1254_v63  ;;  %v669_v3 = vrot.slane %v668_v1, 4 }
 0x384   : > { %v654_v4 = vpop.f32.mrf.mxu2 }
 0x385   : > { %v664_v5 = vrot.slane %v663_v2, 2  ;;  %v670_v7 = vadd.f32 %v669_v3, %v668_v1 }
 0x387   : > { %v665_v9 = vadd.f32 %v664_v5, %v663_v2  ;;  %v671_v10 = vrot.slane %v670_v7, 2 }
 0x389   : > { %v666_v11 = vrot.slane %v665_v9, 1  ;;  %v672_v12 = vadd.f32 %v671_v10, %v670_v7 }
 0x38b   : > { %v667_v13 = vadd.f32 %v666_v11, %v665_v9  ;;  %v673_v14 = vrot.slane %v672_v12, 1 }
 0x38d   : > { %v675_v15 = vsel %vm411_vm6, %v667_v13, 0.0  ;;  %v674_v16 = vadd.f32 %v673_v14, %v672_v12 }
 0x38e   : > { %676 = vadd.xlane.f32.xlu0 %v675_v15 }
 0x38f   : > { %v694_v17 = vsel %vm411_vm6, %v674_v16, 0.0 }
 0x390   : > { %695 = vadd.xlane.f32.xlu1 %v694_v17 }
 0x3a2   : > { %734 = vperm.xlu0 %964, %v1154_v6  }
 0x3aa   : > { %966 = vset.pattern.permute.xlu0 %v1054_v19 }
 0x401   : > { %v677_v20 = vpop.xlane.xlu0 %676 }
 0x402   : > { %v678_v21 = vrot.slane %v677_v20, 4 }
 0x403   : > { %v696_v22 = vpop.xlane.xlu1 %695 }
 0x404   : > { %v679_v23 = vadd.f32 %v678_v21, %v677_v20  ;;  %v697_v24 = vrot.slane %v696_v22, 4 }
 0x406   : > { %v680_v25 = vrot.slane %v679_v23, 2  ;;  %v698_v26 = vadd.f32 %v697_v24, %v696_v22 }
 0x408   : > { %v699_v27 = vrot.slane %v698_v26, 2  ;;  %v681_v28 = vadd.f32 %v680_v25, %v679_v23 }
 0x40a   : > { %v700_v30 = vadd.f32 %v699_v27, %v698_v26  ;;  %v682_v31 = vrot.slane %v681_v28, 1 }
 0x40c   : > { %v683_v32 = vadd.f32 %v682_v31, %v681_v28  ;;  %v701_v33 = vrot.slane %v700_v30, 1 }
 0x40e   : > { %903 = vpush %v683_v32  ;;  %v702_v34 = vadd.f32 %v701_v33, %v700_v30 }
 0x410   : > { %905 = vpush %v702_v34 }
 0x414   : > { %v735_v47 = vpop.permute.xlu0 %734 }
 0x43f   : > { %s904_s30 = spop %903 }
 0x440   : > { %s693_s6 = smul.f32 %s904_s30, %s1203_s17 }
 0x441   : > { %s906_s7 = spop %905 }
 0x442   : > { %s713_s8 = smul.f32 %s693_s6, %s693_s6 }
 0x443   : > { %s712_s9 = smul.f32 %s906_s7, %s1203_s17  ;;  %s213_s17 = sand.u32 1, %s1033_s19  }
 0x444   : > { %s868_s12 = sshll.u32 %s213_s17, 3  ;;  %s790_s7 = scalar_lea.sflag [#allocation3], %s213_s17 }
 0x445   : > { %s714_s14 = ssub.f32 %s712_s9, %s713_s8  ;;  %s215_s26 = scalar_lea.vmem [#allocation2], %s868_s12 }
 0x446   : > { %s802_s30 = sshll.u32 %s215_s26, 4  ;;  %s803_s30 = int_to_ptr.vmem [resolvable:$true] %s802_s30 }
 0x447   : > { %s715_s15 = sadd.f32 1e-05, %s714_s14 }
 0x449   : > { %v716_v6 = vstv %s715_s15  ;;  %s999_s15 = scalar_lea.hbm %s1306_s5, 16 }
 0x44a   : > { %975 = vrsqrt.f32 %v716_v6  ;;  %vm723_vm3 = vweird.f32 %v716_v6 }
 0x450   : > { %v976_v35 = vpop.eup %975 }
 0x451   : > { %v718_v36 = vmul.f32 %v976_v35, %v716_v6  ;;  %vm724_vm2 = vweird.f32 %v976_v35 }
 0x452   : > { %vm725_vm4 = vmor %vm723_vm3, %vm724_vm2 }
 0x453   : > { %v719_v37 = vmul.f32 %v976_v35, %v718_v36 }
 0x455   : > { %v720_v38 = vmul.f32 0.5, %v719_v37 }
 0x457   : > { %v721_v39 = vsub.f32 1.5, %v720_v38 }
 0x459   : > { %v722_v40 = vmul.f32 %v976_v35, %v721_v39 }
 0x45b   : > { %v726_v41 = vsel %vm725_vm4, %v976_v35, %v722_v40 }
 0x45c   : > { %907 = vpush %v726_v41 }
 0x48d   : > { %s908_s10 = spop %907 }
 0x48e   : > { %s728_s11 = smul.f32 %s908_s10, %s693_s6  ;;  %v729_v42 = vstv %s908_s10  ;;  %s804_s6 = sshll.u32 %s800_s25, 4  ;;  %s805_s6 = int_to_ptr.hbm [resolvable:$true] %s804_s6 }
 0x48f   : > { %v730_v43 = vmul.f32 %v729_v42, %v1254_v63  ;;  %s993_s22 = sshra.s32 %s805_s6, 4  ;;  %s994_s22 = int_to_ptr.hbm [resolvable:$true] %s993_s22 }
 0x490   : > { %v731_v45 = vstv %s728_s11  ;;  %s995_s8 = scalar_lea.hbm %s994_s22, 8  ;;  %p1000_p0 = scmp.lt.s32.totalorder %s994_s22, %s1306_s5 }
 0x491   : > { %v732_v48 = vsub.f32 %v730_v43, %v731_v45  ;;  %p996_p11 = scmp.ne.s32.totalorder %s994_s22, %s995_s8  ;;  %p1001_p1 = scmp.lt.s32.totalorder %s999_s15, %s995_s8 }
 0x493   : > { %v737_v50 = vmul.f32 %v735_v47, %v732_v48  ;;  %p997_p12 = pnand %p996_p11, %p1123_p5  ;;  %p1002_p2 = por %p1001_p1, %p1000_p0 }
 0x495   : > { %v742_v51 = vadd.f32 %v740_v49, %v737_v50  ;;  %p998_p13 = pneg %p997_p12 }
 0x497   : > { %v744_v52 = vmul.f32 %v742_v51, %v1213_v46  ;;  %v743_v23 = vmul.f32 0.5, %v742_v51  ;;  %p1003_p3 = pnand %p1002_p2, %p998_p13 }
 0x499   : > { %v745_v8 = vmul.f32 %v744_v52, %v744_v52 }
 0x49b   : > { %v746_v53 = vmin.f32 %v745_v8, 16.0 }
 0x49d   : > { %v747_v54 = vmul.f32 2.1237322e-06, %v746_v53  ;;  %v758_v55 = vmul.f32 3.8918573e-05, %v746_v53 }
 0x49f   : > { %v748_v56 = vadd.f32 0.00028619796, %v747_v54  ;;  %v759_v44 = vadd.f32 0.001143296, %v758_v55 }
 0x4a1   : > { %v749_v57 = vmul.f32 %v748_v56, %v746_v53  ;;  %v760_v58 = vmul.f32 %v759_v44, %v746_v53 }
 0x4a3   : > { %v761_v59 = vadd.f32 0.014752088, %v760_v58  ;;  %v750_v60 = vadd.f32 0.0036580483, %v749_v57 }
 0x4a5   : > { %v762_v61 = vmul.f32 %v761_v59, %v746_v53  ;;  %v751_v63 = vmul.f32 %v750_v60, %v746_v53 }
 0x4a7   : > { %v763_v62 = vadd.f32 0.112945676, %v762_v61  ;;  %v752_v2 = vadd.f32 0.05243302, %v751_v63 }
 0x4a9   : > { %v764_v0 = vmul.f32 %v763_v62, %v746_v53  ;;  %v753_v46 = vmul.f32 %v752_v2, %v746_v53 }
 0x4ab   : > { %v765_v1 = vadd.f32 0.4994258, %v764_v0  ;;  %v754_v5 = vadd.f32 0.18741608, %v753_v46 }
 0x4ad   : > { %v766_v3 = vmul.f32 %v765_v1, %v746_v53  ;;  %v755_v9 = vmul.f32 %v754_v5, %v746_v53 }
 0x4af   : > { %v767_v4 = vadd.f32 1.0, %v766_v3  ;;  %v756_v13 = vadd.f32 1.1283791, %v755_v9 }
 0x4b1   : > { %977 = vrcp.f32 %v767_v4  ;;  %v779_v12 = vand.u32 2147483648, %v767_v4  ;;  %v777_v15 = vand.u32 2147483647, %v767_v4  ;;  %vm773_vm6 = vweird.f32 %v767_v4 }
 0x4b2   : > { %v757_v18 = vmul.f32 %v756_v13, %v744_v52 }
 0x4b3   : > { %v780_v17 = vor.u32 1.1754944e-38, %v779_v12  ;;  %vm778_vm8 = vcmp.eq.f32.partialorder %v777_v15, 8.507059e+37 }
 0x4b7   : > { %v978_v7 = vpop.eup %977 }
 0x4b8   : > { %v769_v10 = vmul.f32 %v978_v7, %v767_v4  ;;  %vm774_vm5 = vweird.f32 %v978_v7 }
 0x4b9   : > { %vm775_vm7 = vmor %vm773_vm6, %vm774_vm5 }
 0x4ba   : > { %v770_v11 = vsub.f32 1.0, %v769_v10 }
 0x4bc   : > { %v771_v14 = vmul.f32 %v978_v7, %v770_v11 }
 0x4be   : > { %v772_v16 = vadd.f32 %v978_v7, %v771_v14 }
 0x4c0   : > { %v776_v19 = vsel %vm775_vm7, %v978_v7, %v772_v16 }
 0x4c1   : > { %v781_v20 = vsel %vm778_vm8, %v780_v17, %v776_v19 }
 0x4c2   : > { %v782_v21 = vmul.f32 %v781_v20, %v757_v18 }
 0x4c4   : > { %v890_v22 = vclamps-f32 %v782_v21, 1.0 }
 0x4c6   : > { %v785_v24 = vadd.f32 1.0, %v890_v22 }
 0x4c8   : > { %v786_v25 = vmul.f32 %v785_v24, %v743_v23 }
 0x4ca   : > { %v787_v26 = vadd.f32 %v786_v25, %v1191_v29 }
 0x4cc   : > { %788 = vst [vmem:[%s215_s26] sm:$0xff] %v787_v26 }
 0x4cd   : > { %1006 = shalt.err (!%p1003_p3)
}
 0x4ce   : > { %909 = dma.vmem_to_hbm [thread:$0]  (%p1123_p5), %s803_s30, 128, %s805_s6, %s790_s7  }
 0x4cf PF: > { %p915_p4 = scmp.ge.s32.totalorder %s1041_s21, 2  ;;  %s816_s17 = sand.u32 1, %s1029_s18  }
 0x4d0   : > { %s817_s12 = scalar_lea.sflag [#allocation3], %s816_s17 }
 0x4d1   : > { %p912_p7 = pnand %p915_p4, %p1127_p6 }
 0x4d3   : > { %p913_p8 = pneg %p912_p7 }
 0x4d5   : > { %1024 = dma.done.wait (%p913_p8), %s817_s12, 128  }
 0x4d6   : > { %1026 = vsyncadd (%p913_p8), %s817_s12, 4294967168  ;;  %p15_p9 = scmp.ge.s32.totalorder %s1110_s24, 4   ;;  %s1309_s18 = smov %s1033_s19 }
 0x4d7   : > { %s1310_s19 = smov %s1037_s20  ;;  %s1311_s20 = smov %s1121_s27 }
 0x4d8   : > { %s1312_s21 = smov %s1110_s24  ;;  %17 = sbr.rel (!%p15_p9) target bundleno = 3 (0x3), region = 83 }
 0x4dd   :  { %823 = vsyncpa [#allocation3], 1 }
 0x4de   :  { %825 = vsyncpa [#allocation3 + $0x1], 1 }

</bundles_post_ra>
